<compile_context>
chip_gen: v7x
topology: tpu7x:2x2x1
jax: 0.10.0
libtpu: 0.0.40
codegen_flags: <defaults>
</compile_context>

<pallas_src>
import functools

import jax
import jax.numpy as jnp
from jax.experimental import pallas as pl
from jax.experimental.pallas import tpu as pltpu


def _round_up(a, b):
    return (a + b - 1) // b * b


def layernorm_kernel(x_ref, w_ref, b_ref, o_ref, *, eps, hidden, hidden_pad):
    x = x_ref[...].astype(jnp.float32)               # (tile_rows, hidden_pad)
    inv_h = 1.0 / hidden
    # Padded lanes are zero-filled wrapper-side, so a plain sum gives the
    # correct mean over the true hidden width.
    u = jnp.sum(x, axis=-1, keepdims=True) * inv_h   # mean over hidden
    d = x - u
    if hidden_pad != hidden:
        # Zero the padded lanes before the variance reduction.
        lane = jax.lax.broadcasted_iota(jnp.int32, x.shape, dimension=1)
        d = jnp.where(lane < hidden, d, 0.0)
    s = jnp.sum(d * d, axis=-1, keepdims=True) * inv_h   # biased variance
    inv = jax.lax.rsqrt(s + eps)                          # EUP (keeps VALU free)
    y = d * inv
    # weight/bias are already f32 (cast once wrapper-side) and VMEM-resident
    # via the constant index_map.
    o_ref[...] = (w_ref[...] * y + b_ref[...]).astype(o_ref.dtype)


def _vmem_capacity_bytes():
    try:
        return int(pltpu.get_tpu_info().vmem_capacity_bytes)
    except Exception:
        return 64 * 1024 * 1024  # v7x-safe fallback


def _choose_tile_rows(rows, hidden_pad, itemsize):
    vmem_cap = _vmem_capacity_bytes()
    # 2 double-buffered input buffers + 2 double-buffered output buffers per
    # tile must fit with headroom (v7x: 64 MiB physical; v5e/v6e: 128 MiB).
    budget = min(vmem_cap // 2, 48 * 1024 * 1024)
    bytes_per_row = hidden_pad * max(int(itemsize), 4)
    tr = budget // (4 * bytes_per_row)
    tr = max(8, min(int(tr), 1024))
    tr = (tr // 8) * 8                               # sublane-aligned
    rows_8 = _round_up(max(rows, 1), 8)
    # Keep at least ~4 grid steps when the problem is big enough so
    # double-buffering overlaps and v7x megacore sharding has work per core.
    if rows_8 >= 4 * 8:
        tr = min(tr, max(8, (rows_8 // 4) // 8 * 8))
    tr = min(tr, rows_8)
    return tr, vmem_cap


def layernorm(x, weight, bias, eps=1e-12, tile_rows=None):
    orig_shape = x.shape
    hidden = orig_shape[-1]
    rows = 1
    for d in orig_shape[:-1]:
        rows *= d

    hidden_pad = _round_up(hidden, 128)              # lane-dense output slab

    x2 = x.reshape(rows, hidden)
    w2 = weight.astype(jnp.float32).reshape(1, hidden)
    b2 = bias.astype(jnp.float32).reshape(1, hidden)
    if hidden_pad != hidden:
        x2 = jnp.pad(x2, ((0, 0), (0, hidden_pad - hidden)))
        w2 = jnp.pad(w2, ((0, 0), (0, hidden_pad - hidden)))
        b2 = jnp.pad(b2, ((0, 0), (0, hidden_pad - hidden)))

    itemsize = jnp.dtype(x.dtype).itemsize
    if tile_rows is None:
        tr, vmem_cap = _choose_tile_rows(rows, hidden_pad, itemsize)
    else:
        tr = max(8, (int(tile_rows) // 8) * 8)
        vmem_cap = _vmem_capacity_bytes()

    # Pad rows to a multiple of the tile (instead of shrinking the tile to a
    # sublane-sparse width); padded rows are sliced off afterwards.
    rows_pad = _round_up(rows, tr)
    if rows_pad != rows:
        x2 = jnp.pad(x2, ((0, rows_pad - rows), (0, 0)))

    grid = (rows_pad // tr,)

    # Explicit scoped-VMEM limit so the enlarged tiles are accepted on
    # v5e/v6e default limits, with headroom under the physical capacity.
    need = 4 * tr * hidden_pad * max(int(itemsize), 4) + 4 * hidden_pad * 4 + (4 << 20)
    vmem_limit = int(min(max(need, 32 << 20), max(vmem_cap - (8 << 20), need)))

    kernel = functools.partial(
        layernorm_kernel, eps=eps, hidden=hidden, hidden_pad=hidden_pad
    )

    out = pl.pallas_call(
        kernel,
        out_shape=jax.ShapeDtypeStruct((rows_pad, hidden_pad), x.dtype),
        grid_spec=pltpu.PrefetchScalarGridSpec(
            num_scalar_prefetch=0,
            grid=grid,
            in_specs=[
                pl.BlockSpec((tr, hidden_pad), lambda i: (i, 0)),
                pl.BlockSpec((1, hidden_pad), lambda i: (0, 0)),
                pl.BlockSpec((1, hidden_pad), lambda i: (0, 0)),
            ],
            out_specs=pl.BlockSpec((tr, hidden_pad), lambda i: (i, 0)),
        ),
        compiler_params=pltpu.CompilerParams(
            dimension_semantics=("parallel",),
            vmem_limit_bytes=vmem_limit,
        ),
    )(x2, w2, b2)

    if rows_pad != rows or hidden_pad != hidden:
        out = out[:rows, :hidden]
    return out.reshape(orig_shape)


def layernorm_ref(x, weight, bias, eps=1e-12):
    u = jnp.mean(x, axis=-1, keepdims=True)
    s = jnp.mean((x - u) ** 2, axis=-1, keepdims=True)
    y = (x - u) / jnp.sqrt(s + eps)
    return weight * y + bias


if __name__ == "__main__":
    key = jax.random.PRNGKey(0)
    batch, seq, hidden = 2, 8, 32
    x = jax.random.normal(key, (batch, seq, hidden), dtype=jnp.float32)

    # Matches nn.Parameter(torch.ones(hidden)) / torch.zeros(hidden)
    weight = jnp.ones((hidden,), dtype=jnp.float32)
    bias = jnp.zeros((hidden,), dtype=jnp.float32)

    out = layernorm(x, weight, bias, eps=1e-12)
    out = jax.block_until_ready(out)

    ref = layernorm_ref(x, weight, bias, eps=1e-12)
    assert out.shape == x.shape
    assert jnp.allclose(out, ref, atol=1e-5, rtol=1e-5), "mismatch vs reference"
    print("KERNEL_OK")
</pallas_src>

<mosaic_0001>
module attributes {stable_mosaic.version = 11 : i64} {
  func.func @layernorm_kernel(%arg0: i32, %arg1: memref<16x128xf32, #tpu.memory_space<vmem>>, %arg2: memref<1x128xf32, #tpu.memory_space<vmem>>, %arg3: memref<1x128xf32, #tpu.memory_space<vmem>>, %arg4: memref<16x128xf32, #tpu.memory_space<vmem>>) attributes {dimension_semantics = [#tpu.dimension_semantics<parallel>], iteration_bounds = array<i64: 1>, scalar_prefetch = 0 : i64, scratch_operands = 0 : i64, tpu.core_type = #tpu.core_type<tc>, window_params = [{transform_indices = @transform_0, window_bounds = array<i64: 16, 128>}, {pipeline_mode = #tpu.pipeline_mode<synchronous>, transform_indices = @transform_1, window_bounds = array<i64: 1, 128>}, {pipeline_mode = #tpu.pipeline_mode<synchronous>, transform_indices = @transform_2, window_bounds = array<i64: 1, 128>}, {transform_indices = @transform_3, window_bounds = array<i64: 16, 128>}]} {
    %c0 = arith.constant 0 : index
    %c0_0 = arith.constant 0 : index
    %0 = vector.load %arg1[%c0, %c0_0] : memref<16x128xf32, #tpu.memory_space<vmem>>, vector<16x128xf32>
    %cst = arith.constant dense<0.000000e+00> : vector<16xf32>
    %1 = vector.multi_reduction <add>, %0, %cst [1] : vector<16x128xf32> to vector<16xf32>
    %2 = vector.shape_cast %1 : vector<16xf32> to vector<16x1xf32>
    %cst_1 = arith.constant 3.125000e-02 : f32
    %3 = vector.broadcast %cst_1 : f32 to vector<16x1xf32>
    %4 = arith.mulf %2, %3 : vector<16x1xf32>
    %5 = vector.broadcast %4 : vector<16x1xf32> to vector<16x128xf32>
    %6 = arith.subf %0, %5 : vector<16x128xf32>
    %7 = tpu.iota {dimensions = array<i32: 1>} : vector<16x128xi32>
    %c32_i32 = arith.constant 32 : i32
    %8 = vector.broadcast %c32_i32 : i32 to vector<16x128xi32>
    %9 = arith.cmpi slt, %7, %8 : vector<16x128xi32>
    %cst_2 = arith.constant 0.000000e+00 : f32
    %10 = vector.broadcast %cst_2 : f32 to vector<16x128xf32>
    %11 = arith.select %9, %6, %10 : vector<16x128xi1>, vector<16x128xf32>
    %12 = arith.mulf %11, %11 : vector<16x128xf32>
    %cst_3 = arith.constant dense<0.000000e+00> : vector<16xf32>
    %13 = vector.multi_reduction <add>, %12, %cst_3 [1] : vector<16x128xf32> to vector<16xf32>
    %14 = vector.shape_cast %13 : vector<16xf32> to vector<16x1xf32>
    %cst_4 = arith.constant 3.125000e-02 : f32
    %15 = vector.broadcast %cst_4 : f32 to vector<16x1xf32>
    %16 = arith.mulf %14, %15 : vector<16x1xf32>
    %cst_5 = arith.constant 9.99999996E-13 : f32
    %17 = vector.broadcast %cst_5 : f32 to vector<16x1xf32>
    %18 = arith.addf %16, %17 : vector<16x1xf32>
    %19 = math.rsqrt %18 : vector<16x1xf32>
    %20 = vector.broadcast %19 : vector<16x1xf32> to vector<16x128xf32>
    %21 = arith.mulf %11, %20 : vector<16x128xf32>
    %c0_6 = arith.constant 0 : index
    %c0_7 = arith.constant 0 : index
    %22 = vector.load %arg2[%c0_6, %c0_7] : memref<1x128xf32, #tpu.memory_space<vmem>>, vector<1x128xf32>
    %23 = vector.broadcast %22 : vector<1x128xf32> to vector<16x128xf32>
    %24 = arith.mulf %23, %21 : vector<16x128xf32>
    %c0_8 = arith.constant 0 : index
    %c0_9 = arith.constant 0 : index
    %25 = vector.load %arg3[%c0_8, %c0_9] : memref<1x128xf32, #tpu.memory_space<vmem>>, vector<1x128xf32>
    %26 = vector.broadcast %25 : vector<1x128xf32> to vector<16x128xf32>
    %27 = arith.addf %24, %26 : vector<16x128xf32>
    %c0_10 = arith.constant 0 : index
    %c0_11 = arith.constant 0 : index
    %28 = vector.load %arg4[%c0_10, %c0_11] : memref<16x128xf32, #tpu.memory_space<vmem>>, vector<16x128xf32>
    tpu.vector_store %arg4[%c0_10, %c0_11], %27 {strides = array<i32>} : memref<16x128xf32, #tpu.memory_space<vmem>>, vector<16x128xf32>,
    return
  }
  func.func @transform_0(%arg0: i32) -> (i32, i32) {
    %c0_i32 = arith.constant 0 : i32
    %c0_i32_0 = arith.constant 0 : i32
    return %arg0, %c0_i32 : i32, i32
  }
  func.func @transform_1(%arg0: i32) -> (i32, i32) {
    %c0_i32 = arith.constant 0 : i32
    %c0_i32_0 = arith.constant 0 : i32
    %c0_i32_1 = arith.constant 0 : i32
    return %c0_i32, %c0_i32_0 : i32, i32
  }
  func.func @transform_2(%arg0: i32) -> (i32, i32) {
    %c0_i32 = arith.constant 0 : i32
    %c0_i32_0 = arith.constant 0 : i32
    %c0_i32_1 = arith.constant 0 : i32
    return %c0_i32, %c0_i32_0 : i32, i32
  }
  func.func @transform_3(%arg0: i32) -> (i32, i32) {
    %c0_i32 = arith.constant 0 : i32
    %c0_i32_0 = arith.constant 0 : i32
    return %arg0, %c0_i32 : i32, i32
  }
}

</mosaic_0001>

<bundles_post_ra>
// kernel: tpu_custom_call.1
= control target key start
LH: loop header
LB: loop body
LE: loop exit
PB: predicated region body
PF: predicated region fallthrough
CT: control target
= control target key end

     0   :  { %8 = vsyncpa [#allocation3], 0  ;;  %s213_s0 = inlined_call_operand.hbm [shape: f32[16,128], index: 0, kind: input, shape index: {}]   ;;  %s214_s1 = inlined_call_operand.vmem [shape: f32[1,128], index: 1, kind: input, shape index: {}]   ;;  %s215_s2 = inlined_call_operand.vmem [shape: f32[1,128], index: 2, kind: input, shape index: {}]   ;;  %s216_s3 = inlined_call_operand.hbm [shape: f32[16,128], index: 3, kind: output, shape index: {}]  }
   0x1   :  { %9 = vsyncpa [#allocation4], 0  ;;  %s153_s12 = smov [#allocation2]   ;;  %s105_s16 = scalar_lea.hbm %s213_s0, 256 }
   0x2   :  { %s15_s13 = sshll.u32 %s153_s12, 4  ;;  %p106_p0 = scmp.ne.s32.totalorder %s213_s0, %s105_s16  ;;  %s16_s13 = int_to_ptr.vmem [resolvable:$true] %s15_s13 }
   0x3   :  { %p109_p1 = scmp.lt.u32.totalorder %s105_s16, %s213_s0 }
   0x5   :  { %p111_p2 = pnand %p109_p1, %p106_p0 }
   0x7   :  { %114 = shalt.err (!%p111_p2)
}
   0x8   :  { %s115_s21 = scalar_lea.vmem %s16_s13, 256  ;;  %p120_p4 = scmp.lt.s32.totalorder %s16_s13, %s16_s13 }
   0x9   :  { %p116_p3 = scmp.ne.s32.totalorder %s16_s13, %s115_s21  ;;  %p121_p5 = scmp.lt.s32.totalorder %s115_s21, %s115_s21 }
   0xb   :  { %p122_p6 = por %p121_p5, %p120_p4 }
   0xd   :  { %p123_p7 = pnand %p122_p6, %p116_p3 }
   0xf   :  { %126 = shalt.err (!%p123_p7)
}
  0x10   :  { %s154_s22 = smov 128   ;;  %s155_s23 = smov 8  }
  0x11   :  { %21 = dma.hbm_to_vmem [thread:$0]  %s213_s0, 256, %s16_s13, [#allocation3], %s154_s22, %s154_s22, %s155_s23  }
  0x12   :  { %149 = dma.done.wait [#allocation3], 256  }
  0x13   :  { %150 = vsyncadd [#allocation3], 4294967040  ;;  %v29_v0 = vld [vmem:[#allocation2] sm:$0xff]  ;;  %v30_v1 = vld [vmem:[#allocation2 + $0x8] sm:$0xff]  ;;  %v39_v2 = vlaneseq  ;;  %s156_s29 = smov [#allocation5]  }
  0x14   :  { %31 = vadd.xlane.f32.xlu0 %v29_v0  ;;  %v95_v21 = vld [vmem:[%s214_s1] ss:$0 sm:$0xff]  ;;  %s83_s30 = sshll.u32 %s156_s29, 4  ;;  %s84_s30 = int_to_ptr.vmem [resolvable:$true] %s83_s30 }
  0x15   :  { %v40_v3 = vand.u32 127, %v39_v2  ;;  %v96_v23 = vld [vmem:[%s215_s2] ss:$0 sm:$0xff]  ;;  %s127_s4 = scalar_lea.vmem %s84_s30, 256  ;;  %p132_p9 = scmp.lt.s32.totalorder %s84_s30, %s84_s30 }
  0x16   :  { %p128_p8 = scmp.ne.s32.totalorder %s84_s30, %s127_s4  ;;  %p133_p10 = scmp.lt.s32.totalorder %s127_s4, %s127_s4 }
  0x17   :  { %vm41_vm0 = vcmp.lt.s32.totalorder %v40_v3, 32 }
  0x18   :  { %33 = vadd.xlane.f32.xlu0 %v30_v1  ;;  %p134_p11 = por %p133_p10, %p132_p9 }
  0x1a   :  { %p135_p12 = pnand %p134_p11, %p128_p8 }
  0xa1   :  { %v32_v4 = vpop.xlane.xlu0 %31 }
  0xa2   :  { %v35_v5 = vmul.f32 0.03125, %v32_v4 }
  0xa4   :  { %v37_v6 = vsub.f32 %v29_v0, %v35_v5 }
  0xa5   :  { %v34_v7 = vpop.xlane.xlu0 %33 }
  0xa6   :  { %v36_v8 = vmul.f32 0.03125, %v34_v7  ;;  %v42_v9 = vsel %vm41_vm0, %v37_v6, 0.0 }
  0xa7   :  { %v44_v10 = vmul.f32 %v42_v9, %v42_v9 }
  0xa8   :  { %v38_v11 = vsub.f32 %v30_v1, %v36_v8 }
  0xa9   :  { %46 = vadd.xlane.f32.xlu1 %v44_v10 }
  0xaa   :  { %v43_v12 = vsel %vm41_vm0, %v38_v11, 0.0 }
  0xab   :  { %v45_v13 = vmul.f32 %v43_v12, %v43_v12 }
  0xad   :  { %48 = vadd.xlane.f32.xlu1 %v45_v13 }
 0x136   :  { %v47_v14 = vpop.xlane.xlu1 %46 }
 0x137   :  { %v50_v15 = vmul.f32 0.03125, %v47_v14 }
 0x139   :  { %v52_v16 = vadd.f32 1e-12, %v50_v15 }
 0x13a   :  { %v49_v17 = vpop.xlane.xlu1 %48 }
 0x13b   :  { %101 = vrsqrt.f32 %v52_v16  ;;  %v51_v18 = vmul.f32 0.03125, %v49_v17 }
 0x13d   :  { %v53_v19 = vadd.f32 1e-12, %v51_v18 }
 0x13f   :  { %103 = vrsqrt.f32 %v53_v19 }
 0x145   :  { %v102_v20 = vpop.eup %101 }
 0x146   :  { %v56_v22 = vmul.f32 %v102_v20, %v42_v9 }
 0x148   :  { %v65_v24 = vmul.f32 %v95_v21, %v56_v22 }
 0x149   :  { %v104_v25 = vpop.eup %103 }
 0x14a   :  { %v57_v26 = vmul.f32 %v104_v25, %v43_v12  ;;  %v74_v27 = vadd.f32 %v96_v23, %v65_v24 }
 0x14c   :  { %v66_v28 = vmul.f32 %v95_v21, %v57_v26  ;;  %76 = vst [vmem:[#allocation5] sm:$0xff] %v74_v27 }
 0x14e   :  { %v75_v29 = vadd.f32 %v96_v23, %v66_v28 }
 0x150   :  { %77 = vst [vmem:[#allocation5 + $0x8] sm:$0xff] %v75_v29 }
 0x151   :  { %138 = shalt.err (!%p135_p12)
}
 0x152   :  { %s139_s5 = scalar_lea.hbm %s216_s3, 256 }
 0x153   :  { %p140_p13 = scmp.ne.s32.totalorder %s216_s3, %s139_s5  ;;  %p143_p0 = scmp.lt.u32.totalorder %s139_s5, %s216_s3 }
 0x155   :  { %p145_p1 = pnand %p143_p0, %p140_p13 }
 0x157   :  { %148 = shalt.err (!%p145_p1)
}
 0x158   :  { %89 = dma.vmem_to_hbm [thread:$0]  %s84_s30, 256, %s216_s3, [#allocation4], %s154_s22, %s154_s22, %s155_s23  }
 0x159   :  { %151 = dma.done.wait [#allocation4], 256  }
 0x15a   :  { %152 = vsyncadd [#allocation4], 4294967040 }
 0x15b   :  { %93 = vsyncpa [#allocation3], 1 }
 0x15c   :  { %94 = vsyncpa [#allocation4], 1 }

</bundles_post_ra>
